<compile_context>
chip_gen: v6e
topology: v6e:2x2x1
jax: 0.10.0
libtpu: 0.0.40
codegen_flags: <defaults>
</compile_context>

<pallas_src>
import functools

import jax
import jax.numpy as jnp
from jax.experimental import pallas as pl
from jax.experimental.pallas import tpu as pltpu


def _round_up(x, m):
    return ((x + m - 1) // m) * m


def _attr_soft_loss_kernel(scores_ref, attrs_ref, mask_ref, out_ref, *,
                           n_rows, n_cols, mask_rows, mask_cols):
    """One (batch-tile, class-tile) block of the weighted multilabel
    soft-margin loss.

    Exact identity:  y*log σ(x) + (1-y)*log σ(-x) = y*x + log σ(-x)
    with the numerically stable  log σ(-x) = min(-x, 0) - log1p(exp(-|x|)).

    Boundary blocks (B % tb != 0 or C % tc != 0) contain unspecified data in
    the out-of-range rows/lanes; those elements are forced to exactly 0 with
    jnp.where before the sublane-fold partial sum.  Emits a lane-dense
    (8, tc) partial per block; the tiny final reduce and the single divide by
    the true B*C happen once in the wrapper.
    """
    x = scores_ref[...].astype(jnp.float32)   # (tb, tc)
    y = attrs_ref[...].astype(jnp.float32)    # (tb, tc)
    w = mask_ref[...].astype(jnp.float32)     # (tb, tc)
    tb, tc = x.shape                          # static

    log_sig_neg = jnp.minimum(-x, 0.0) - jnp.log1p(jnp.exp(-jnp.abs(x)))
    elem = -(y * x + log_sig_neg) * w         # (tb, tc)

    # Zero out-of-range rows / lanes of boundary blocks.  mask_rows/mask_cols
    # are static Python bools, so the masking code is only emitted for grids
    # that actually have a ragged edge.
    if mask_rows or mask_cols:
        valid = None
        if mask_rows:
            row = pl.program_id(0) * tb + jax.lax.broadcasted_iota(
                jnp.int32, (tb, tc), 0)
            valid = row < n_rows
        if mask_cols:
            col = pl.program_id(1) * tc + jax.lax.broadcasted_iota(
                jnp.int32, (tb, tc), 1)
            cvalid = col < n_cols
            valid = cvalid if valid is None else (valid & cvalid)
        elem = jnp.where(valid, elem, 0.0)

    # Fold the tile's rows into an (8, tc) partial sum: adding tb//8 register
    # groups (pure vreg adds, no cross-lane reduce in the steady-state loop).
    if tb % 8 == 0:
        out_ref[...] = jnp.sum(elem.reshape(tb // 8, 8, tc), axis=0)
    else:
        # tiny-batch case (B < 8): single full-dim block, no fold needed.
        out_ref[...] = elem


def _choose_tiles(B, C, *, tile_c_max, target_step_bytes, max_tile_elems):
    """Pick (tb, tc) so each grid step streams a few MiB of input and the
    double-buffered f32 tiles (+ elementwise temporaries) stay comfortably
    inside VMEM on every TPU generation (v7x: 64 MiB per TensorCore)."""
    tile_c_max = max(128, (tile_c_max // 128) * 128)
    tc = C if C <= tile_c_max else tile_c_max    # full C, or a 128-multiple
    tc_pad = _round_up(tc, 128)                  # lane footprint in VMEM

    if B < 8:
        tb = B                                   # block == full batch dim
    else:
        bytes_per_row = 3 * 4 * tc_pad           # three f32 inputs
        tb = _round_up(max(1, target_step_bytes // bytes_per_row), 8)
        tb = min(tb, max(8, (max_tile_elems // tc_pad) // 8 * 8))  # VMEM cap
        tb = min(tb, (B // 8) * 8)               # never exceed the batch dim
    return tb, tc, tc_pad


def attr_soft_loss_pallas(scores, attributes, loss_mask, *,
                          tile_c_max=2048,
                          target_step_bytes=8 << 20,
                          max_tile_elems=640 * 1024):
    """loss = sum_{b,c} -(y*logσ(x) + (1-y)*logσ(-x)) * w / (B * C).

    Matches F.multilabel_soft_margin_loss(weight=loss_mask[i]) per sample
    (mean over classes) followed by a mean over the batch — i.e. the PyTorch
    AttrSoftLoss.forward, given the same per-sample mask.  Inputs are streamed
    untouched (no pad, no dtype rewrite): one HBM pass per tensor.
    """
    B, C = scores.shape
    tb, tc, tc_pad = _choose_tiles(
        B, C, tile_c_max=tile_c_max, target_step_bytes=target_step_bytes,
        max_tile_elems=max_tile_elems)
    n_b = pl.cdiv(B, tb)
    n_c = pl.cdiv(C, tc)
    out_rows = 8 if tb % 8 == 0 else tb

    # Scoped-VMEM request derived from the actual tile: double-buffered f32
    # inputs + an allowance for elementwise f32 temporaries + the small
    # double-buffered output block; clamped to [32 MiB, 48 MiB] so it leaves
    # headroom on v7x's 64 MiB physical VMEM as well as v5e/v6e's 128 MiB.
    tile_elems = tb * tc_pad
    est = (2 * 3 * 4) * tile_elems + (5 * 4) * tile_elems + 2 * out_rows * tc_pad * 4
    vmem_limit = int(max(32 << 20, min(48 << 20, est * 3 // 2)))

    kernel = functools.partial(
        _attr_soft_loss_kernel,
        n_rows=B, n_cols=C,
        mask_rows=(B % tb != 0), mask_cols=(C % tc != 0))

    partials = pl.pallas_call(
        kernel,
        out_shape=jax.ShapeDtypeStruct((n_b * out_rows, n_c * tc), jnp.float32),
        grid=(n_b, n_c),
        in_specs=[
            pl.BlockSpec((tb, tc), lambda i, j: (i, j)),
            pl.BlockSpec((tb, tc), lambda i, j: (i, j)),
            pl.BlockSpec((tb, tc), lambda i, j: (i, j)),
        ],
        out_specs=pl.BlockSpec((out_rows, tc), lambda i, j: (i, j)),
        compiler_params=pltpu.CompilerParams(
            # every (i, j) writes its own output block -> fully parallel grid,
            # shardable across the two TensorCores on v7x.
            dimension_semantics=("parallel", "parallel"),
            vmem_limit_bytes=vmem_limit,
        ),
    )(scores, attributes, loss_mask)

    # Tiny partial-sum tensor; divide exactly once by the TRUE B*C
    # (out-of-range elements were forced to zero inside the kernel).
    return jnp.sum(partials) / jnp.float32(B * C)


def make_loss_mask(key, attributes):
    """Glue (plain JAX): per row, randomly drop round(95%) of the zero-label
    attribute positions without replacement — mirrors
    np.random.choice(zeros, round(0.95*len(zeros)), False) in the PyTorch
    module.  Host-style stochastic sampling; stays outside the kernel."""
    B, C = attributes.shape
    is_zero = attributes == 0
    n_zero = jnp.sum(is_zero, axis=1)                                     # (B,)
    k = jnp.round(0.95 * n_zero.astype(jnp.float32)).astype(jnp.int32)    # (B,)
    u = jax.random.uniform(key, (B, C))
    keys = jnp.where(is_zero, u, jnp.inf)      # non-zero labels never picked
    rank = jnp.argsort(jnp.argsort(keys, axis=1), axis=1)                 # per-row rank
    drop = rank < k[:, None]
    return jnp.where(drop, 0.0, 1.0).astype(jnp.float32)


def attr_soft_loss_ref(scores, attributes, loss_mask):
    """Pure-JAX reference of the PyTorch forward (given the same loss_mask)."""
    x = scores.astype(jnp.float32)
    y = attributes.astype(jnp.float32)
    ls = jax.nn.log_sigmoid
    elem = -(y * ls(x) + (1.0 - y) * ls(-x)) * loss_mask
    B, C = x.shape
    return jnp.sum(elem) / (B * C)


if __name__ == "__main__":
    # Small, deliberately non-aligned shapes to exercise the ragged-edge path:
    # 10 samples (not a multiple of 8), 200 attributes (not a multiple of 128).
    B, C = 10, 200
    key = jax.random.PRNGKey(0)
    k_scores, k_attrs, k_mask = jax.random.split(key, 3)

    scores = jax.random.normal(k_scores, (B, C), dtype=jnp.float32)
    # binary attribute labels (mostly zeros, like real attribute annotations)
    attributes = (jax.random.uniform(k_attrs, (B, C)) < 0.2).astype(jnp.float32)

    loss_mask = make_loss_mask(k_mask, attributes)
    ref = attr_soft_loss_ref(scores, attributes, loss_mask)

    # default path: single class tile (block last dim == full C)
    loss = attr_soft_loss_pallas(scores, attributes, loss_mask)
    loss = jax.block_until_ready(loss)
    assert jnp.allclose(loss, ref, rtol=1e-5, atol=1e-6), (loss, ref)

    # class-tiled path (v7x-style C tiling with a ragged last lane tile)
    loss2 = attr_soft_loss_pallas(scores, attributes, loss_mask, tile_c_max=128)
    loss2 = jax.block_until_ready(loss2)
    assert jnp.allclose(loss2, ref, rtol=1e-5, atol=1e-6), (loss2, ref)

    print("KERNEL_OK")
</pallas_src>

<mosaic_0001>
module attributes {stable_mosaic.version = 11 : i64} {
  func.func @_attr_soft_loss_kernel(%arg0: i32, %arg1: i32, %arg2: memref<8x200xf32, #tpu.memory_space<vmem>>, %arg3: memref<8x200xf32, #tpu.memory_space<vmem>>, %arg4: memref<8x200xf32, #tpu.memory_space<vmem>>, %arg5: memref<8x200xf32, #tpu.memory_space<vmem>>) attributes {dimension_semantics = [#tpu.dimension_semantics<parallel>, #tpu.dimension_semantics<parallel>], iteration_bounds = array<i64: 2, 1>, scalar_prefetch = 0 : i64, scratch_operands = 0 : i64, tpu.core_type = #tpu.core_type<tc>, window_params = [{transform_indices = @transform_0, window_bounds = array<i64: 8, 200>}, {transform_indices = @transform_1, window_bounds = array<i64: 8, 200>}, {transform_indices = @transform_2, window_bounds = array<i64: 8, 200>}, {transform_indices = @transform_3, window_bounds = array<i64: 8, 200>}]} {
    %c0 = arith.constant 0 : index
    %c0_0 = arith.constant 0 : index
    %0 = vector.load %arg2[%c0, %c0_0] : memref<8x200xf32, #tpu.memory_space<vmem>>, vector<8x200xf32>
    %c0_1 = arith.constant 0 : index
    %c0_2 = arith.constant 0 : index
    %1 = vector.load %arg3[%c0_1, %c0_2] : memref<8x200xf32, #tpu.memory_space<vmem>>, vector<8x200xf32>
    %c0_3 = arith.constant 0 : index
    %c0_4 = arith.constant 0 : index
    %2 = vector.load %arg4[%c0_3, %c0_4] : memref<8x200xf32, #tpu.memory_space<vmem>>, vector<8x200xf32>
    %cst = arith.constant 0.000000e+00 : f32
    %3 = vector.broadcast %cst : f32 to vector<8x200xf32>
    %4 = arith.subf %3, %0 : vector<8x200xf32>
    %cst_5 = arith.constant 0.000000e+00 : f32
    %5 = vector.broadcast %cst_5 : f32 to vector<8x200xf32>
    %6 = arith.minimumf %4, %5 : vector<8x200xf32>
    %7 = math.absf %0 : vector<8x200xf32>
    %cst_6 = arith.constant 0.000000e+00 : f32
    %8 = vector.broadcast %cst_6 : f32 to vector<8x200xf32>
    %9 = arith.subf %8, %7 : vector<8x200xf32>
    %10 = math.exp %9 : vector<8x200xf32>
    %11 = math.log1p %10 : vector<8x200xf32>
    %12 = arith.subf %6, %11 : vector<8x200xf32>
    %13 = arith.mulf %1, %0 : vector<8x200xf32>
    %14 = arith.addf %13, %12 : vector<8x200xf32>
    %cst_7 = arith.constant 0.000000e+00 : f32
    %15 = vector.broadcast %cst_7 : f32 to vector<8x200xf32>
    %16 = arith.subf %15, %14 : vector<8x200xf32>
    %17 = arith.mulf %16, %2 : vector<8x200xf32>
    %c8_i32 = arith.constant 8 : i32
    %18 = arith.muli %arg0, %c8_i32 : i32
    %19 = tpu.iota {dimensions = array<i32: 0>} : vector<8x200xi32>
    %20 = vector.broadcast %18 : i32 to vector<8x200xi32>
    %21 = arith.addi %20, %19 : vector<8x200xi32>
    %c10_i32 = arith.constant 10 : i32
    %22 = vector.broadcast %c10_i32 : i32 to vector<8x200xi32>
    %23 = arith.cmpi slt, %21, %22 : vector<8x200xi32>
    %cst_8 = arith.constant 0.000000e+00 : f32
    %24 = vector.broadcast %cst_8 : f32 to vector<8x200xf32>
    %25 = arith.select %23, %17, %24 : vector<8x200xi1>, vector<8x200xf32>
    %26 = vector.shape_cast %25 : vector<8x200xf32> to vector<1x8x200xf32>
    %cst_9 = arith.constant dense<0.000000e+00> : vector<8x200xf32>
    %27 = vector.multi_reduction <add>, %26, %cst_9 [0] : vector<1x8x200xf32> to vector<8x200xf32>
    %c0_10 = arith.constant 0 : index
    %c0_11 = arith.constant 0 : index
    %28 = vector.load %arg5[%c0_10, %c0_11] : memref<8x200xf32, #tpu.memory_space<vmem>>, vector<8x200xf32>
    tpu.vector_store %arg5[%c0_10, %c0_11], %27 {strides = array<i32>} : memref<8x200xf32, #tpu.memory_space<vmem>>, vector<8x200xf32>,
    return
  }
  func.func @transform_0(%arg0: i32, %arg1: i32) -> (i32, i32) {
    %c0_i32 = arith.constant 0 : i32
    return %arg0, %arg1 : i32, i32
  }
  func.func @transform_1(%arg0: i32, %arg1: i32) -> (i32, i32) {
    %c0_i32 = arith.constant 0 : i32
    return %arg0, %arg1 : i32, i32
  }
  func.func @transform_2(%arg0: i32, %arg1: i32) -> (i32, i32) {
    %c0_i32 = arith.constant 0 : i32
    return %arg0, %arg1 : i32, i32
  }
  func.func @transform_3(%arg0: i32, %arg1: i32) -> (i32, i32) {
    %c0_i32 = arith.constant 0 : i32
    return %arg0, %arg1 : i32, i32
  }
}

</mosaic_0001>

<bundles_post_ra>
// kernel: tpu_custom_call.1
= control target key start
LH: loop header
LB: loop body
LE: loop exit
PB: predicated region body
PF: predicated region fallthrough
CT: control target
= control target key end

     0   :  { %s1016_s0 = inlined_call_operand.hbm [shape: f32[10,200], index: 0, kind: input, shape index: {}]   ;;  %s1017_s1 = inlined_call_operand.hbm [shape: f32[10,200], index: 1, kind: input, shape index: {}]   ;;  %s1018_s2 = inlined_call_operand.hbm [shape: f32[10,200], index: 2, kind: input, shape index: {}]   ;;  %s1019_s3 = inlined_call_operand.hbm [shape: f32[16,200], index: 3, kind: output, shape index: {}]  }
   0x1   :  { %1023 = sst [smem:[#allocation14_spill]] %s1017_s1 }
   0x2   :  { %8 = vsyncpa [#allocation3], 0 }
   0x3   :  { %10 = vsyncpa [#allocation3 + $0x1], 0 }
   0x4   :  { %11 = vsyncpa [#allocation6], 0 }
   0x5   :  { %13 = vsyncpa [#allocation6 + $0x1], 0 }
   0x6   :  { %14 = vsyncpa [#allocation4], 0 }
   0x7   :  { %16 = vsyncpa [#allocation4 + $0x1], 0  ;;  %s801_s12 = smov 0   ;;  %s803_s13 = smov 0  }
   0x8   :  { %s805_s14 = smov 0   ;;  %s807_s15 = smov 0  }
   0x9   :  { %s809_s16 = smov 0   ;;  %s811_s17 = smov 0  }
   0xa LB: > { %1024 = sst [smem:[#allocation12_spill]] %s771_s16  ;;  %s832_s18 = sadd.s32 4294967295, %s775_s17   ;;  %s775_s17 = sphi %s811_s17, %s22_s17   ;;  %s771_s16 = sphi %s809_s16, %s1036_s16   ;;  %s767_s15 = sphi %s807_s15, %s1035_s15   ;;  %s763_s14 = sphi %s805_s14, %s1039_s14   ;;  %s759_s13 = sphi %s803_s13, %s1038_s13   ;;  %s755_s12 = sphi %s801_s12, %s1037_s12  }
   0xb   : > { %s500_s19 = sadd.s32 4294967294, %s775_s17   ;;  %s34_s20 = sadd.s32 1, %s771_s16 }
   0xc   : > { %s43_s21 = sadd.s32 1, %s763_s14  ;;  %p36_p0 = scmp.ge.s32.totalorder %s34_s20, 2 }
   0xd   : > { %p50_p1 = scmp.ne.s32.totalorder %s763_s14, %s759_s13  ;;  %p51_p2 = scmp.eq.s32.totalorder %s775_s17, 0 }
   0xe   : > { %p56_p3 = scmp.ne.s32.totalorder %s759_s13, %s755_s12  ;;  %s1041_s20 = smov (%p36_p0, %s34_s20), 0 }
   0xf   : > { %1025 = sst [smem:[#allocation13_spill]] %s1041_s20  ;;  %p844_p4 = por %p51_p2, %p50_p1 }
  0x10   : > { %p57_p5 = scmp.eq.s32.totalorder %s832_s18, 0  ;;  %s38_s23 = ssub.s32 %s771_s16, %s1041_s20 }
  0x11   : > { %p138_p6 = scmp.eq.s32.totalorder %s832_s18, 1  ;;  %p41_p7 = scmp.eq.s32.totalorder %s38_s23, 0 }
  0x12   : > { %p852_p8 = por %p57_p5, %p56_p3  ;;  %p144_p10 = scmp.eq.s32.totalorder %s500_s19, 1 }
  0x13   : > { %p856_p9 = por %p138_p6, %p50_p1  ;;  %p549_p13 = scmp.lt.s32.totalorder %s775_s17, 2 }
  0x14   : > { %s861_s26 = scalar_select %p41_p7, %s763_s14, %s43_s21  }
  0x15   : > { %p863_p11 = por %p144_p10, %p56_p3  ;;  %s1020_s28 = sand.u32 1, %s763_s14  }
  0x16   : > { %s872_s29 = sshll.u32 %s1020_s28, 4  ;;  %s875_s30 = sshll.u32 %s771_s16, 8 }
  0x17   : > { %p879_p0 = pnand %p549_p13, %p844_p4  ;;  %s185_s5 = sand.u32 1, %s775_s17  }
  0x18   : > { %s1031_s1 = sld [smem:[#allocation14_spill]]  ;;  %s189_s9 = scalar_lea.vmem [#allocation5], %s872_s29 }
  0x19   : > { %s199_s10 = sshll.u32 %s189_s9, 4  ;;  %p512_p1 = scmp.ge.s32.totalorder %s775_s17, 1  ;;  %s200_s10 = int_to_ptr.vmem [resolvable:$true] %s199_s10 }
  0x1a   : > { %p225_p2 = scmp.lt.s32.totalorder %s775_s17, 3  ;;  %s891_s11 = scalar_lea.sflag [#allocation6], %s185_s5 }
  0x1b   : > { %p609_p3 = pneg %p879_p0  ;;  %s620_s19 = scalar_lea.vmem %s200_s10, 256 }
  0x1c   : > { %p621_p4 = scmp.ne.s32.totalorder %s200_s10, %s620_s19  ;;  %s777_s21 = smov [#allocation5]  }
  0x1d   : > { %s625_s22 = sshll.u32 %s777_s21, 4  ;;  %s626_s22 = int_to_ptr.vmem [resolvable:$false] %s625_s22 }
  0x1e   : > { %s197_s8 = scalar_lea.hbm %s1031_s1, %s875_s30  ;;  %p623_p5 = pnand %p621_p4, %p609_p3 }
  0x1f   : > { %s627_s23 = scalar_lea.vmem %s626_s22, 512  ;;  %p628_p7 = scmp.lt.s32.totalorder %s200_s10, %s626_s22 }
  0x20   : > { %p624_p6 = pneg %p623_p5  ;;  %p629_p10 = scmp.lt.s32.totalorder %s627_s23, %s620_s19 }
  0x22   : > { %p630_p13 = por %p629_p10, %p628_p7 }
  0x24   : > { %p631_p12 = pnand %p630_p13, %p624_p6 }
  0x26   : > { %634 = shalt.err (!%p631_p12)
}
  0x27   : > { %541 = dma.hbm_to_vmem [thread:$0]  (!%p879_p0), %s197_s8, 256, %s200_s10, %s891_s11  }
  0x28   : > { %p905_p4 = pnand %p512_p1, %p225_p2  ;;  %s176_s9 = scalar_lea.hbm %s1016_s0, %s875_s30 }
  0x29   : > { %s168_s19 = scalar_lea.vmem [#allocation2], %s872_s29  ;;  %s218_s28 = scalar_lea.hbm %s1018_s2, %s875_s30 }
  0x2a   : > { %s178_s21 = sshll.u32 %s168_s19, 4  ;;  %s1033_s1 = sand.u32 1, %s763_s14   ;;  %s179_s21 = int_to_ptr.vmem [resolvable:$true] %s178_s21 }
  0x2b   : > { %s165_s20 = scalar_lea.sflag [#allocation3], %s1033_s1  ;;  %s648_s8 = scalar_lea.vmem %s179_s21, 256 }
  0x2c   : > { %p649_p12 = scmp.ne.s32.totalorder %s179_s21, %s648_s8  ;;  %s778_s10 = smov [#allocation2]  }
  0x2d   : > { %s653_s16 = sshll.u32 %s778_s10, 4  ;;  %s654_s16 = int_to_ptr.vmem [resolvable:$false] %s653_s16 }
  0x2e   : > { %p651_p1 = pnand %p649_p12, %p609_p3  ;;  %s655_s6 = scalar_lea.vmem %s654_s16, 512 }
  0x2f   : > { %p656_p5 = scmp.lt.s32.totalorder %s179_s21, %s654_s16  ;;  %p657_p6 = scmp.lt.s32.totalorder %s655_s6, %s648_s8 }
  0x30   : > { %p652_p2 = pneg %p651_p1 }
  0x31   : > { %p658_p7 = por %p657_p6, %p656_p5 }
  0x33   : > { %p659_p10 = pnand %p658_p7, %p652_p2 }
  0x35   : > { %662 = shalt.err (!%p659_p10)
}
  0x36   : > { %538 = dma.hbm_to_vmem [thread:$0]  (!%p879_p0), %s176_s9, 256, %s179_s21, %s165_s20  }
  0x37   : > { %s210_s1 = scalar_lea.vmem [#allocation7], %s872_s29  ;;  %s779_s22 = smov [#allocation7]  }
  0x38   : > { %s220_s7 = sshll.u32 %s210_s1, 4  ;;  %s681_s16 = sshll.u32 %s779_s22, 4  ;;  %s221_s7 = int_to_ptr.vmem [resolvable:$true] %s220_s7  ;;  %s682_s16 = int_to_ptr.vmem [resolvable:$false] %s681_s16 }
  0x39   : > { %s676_s19 = scalar_lea.vmem %s221_s7, 256  ;;  %s683_s23 = scalar_lea.vmem %s682_s16, 512 }
  0x3a   : > { %p677_p13 = scmp.ne.s32.totalorder %s221_s7, %s676_s19  ;;  %p684_p2 = scmp.lt.s32.totalorder %s221_s7, %s682_s16 }
  0x3b   : > { %p685_p5 = scmp.lt.s32.totalorder %s683_s23, %s676_s19 }
  0x3c   : > { %p679_p12 = pnand %p677_p13, %p609_p3 }
  0x3d   : > { %p686_p6 = por %p685_p5, %p684_p2 }
  0x3e   : > { %p680_p1 = pneg %p679_p12 }
  0x40   : > { %p687_p7 = pnand %p686_p6, %p680_p1 }
  0x42   : > { %690 = shalt.err (!%p687_p7)
}
  0x43   : > { %544 = dma.hbm_to_vmem [thread:$0]  (!%p879_p0), %s218_s28, 256, %s221_s7, %s891_s11  }
  0x44   : > { %229 = sbr.rel (%p905_p4) target bundleno = 140 (0x8c), region = 32  ;;  %s940_s9 = sand.u32 (!%p905_p4), 1, %s759_s13  }
  0x45   : > { %s943_s21 = sshll.u32 (!%p905_p4), %s940_s9, 4  ;;  %s232_s4 = scalar_lea.sflag (!%p905_p4), [#allocation3], %s940_s9 }
  0x46   : > { %s235_s8 = scalar_lea.vmem (!%p905_p4), [#allocation2], %s943_s21 }
  0x49   : > { %742 = dma.done.wait (%p852_p8), %s232_s4, 256  }
  0x4a   : > { %744 = vsyncadd (%p852_p8), %s232_s4, 4294967040  ;;  %s240_s28 = sand.u32 1, %s832_s18   ;;  %s244_s11 = scalar_lea.vmem [#allocation5], %s943_s21 }
  0x4b   : > { %s241_s30 = scalar_lea.sflag [#allocation6], %s240_s28 }
  0x4c   : > { %746 = dma.done.wait (%p852_p8), %s241_s30, 512  }
  0x4d   : > { %748 = vsyncadd (%p852_p8), %s241_s30, 4294966784  ;;  %v290_v0 = vld [vmem:[%s235_s8] sm:$0xff]  ;;  %v291_v2 = vld [vmem:[%s235_s8 + $0x8] sm:$0xff]  ;;  %v337_v18 = vlaneseq  ;;  %s517_s18 = sshll.u32 %s767_s15, 3  ;;  %s253_s24 = scalar_lea.vmem [#allocation7], %s943_s21  ;;  %vm347_vm3 = vcmask 588800  }
  0x4e   : > { %v300_v1 = vand.u32 2147483647, %v290_v0  ;;  %v301_v3 = vand.u32 2147483647, %v291_v2  ;;  %v296_v15 = vsub.f32 0.0, %v290_v0  ;;  %v297_v19 = vsub.f32 0.0, %v291_v2 }
  0x4f   : > { %v292_v21 = vld [vmem:[%s244_s11] sm:$0xff]  ;;  %v293_v25 = vld [vmem:[%s244_s11 + $0x8] sm:$0xff]  ;;  %v338_v29 = vshrl.u32 %v337_v18, 7  ;;  %v339_v32 = vstv %s517_s18  ;;  %s285_s5 = scalar_lea.vmem [#allocation8], %s943_s21  ;;  %s526_s6 = sshll.u32 %s767_s15, 8 }
  0x50   : > { %v302_v4 = vsub.f32 0.0, %v300_v1  ;;  %v303_v5 = vsub.f32 0.0, %v301_v3  ;;  %v298_v24 = vmin.f32 %v296_v15, 0.0  ;;  %v299_v30 = vmin.f32 %v297_v19, 0.0  ;;  %v294_v41 = vld [vmem:[%s253_s24] sm:$0xff]  ;;  %s366_s10 = sshll.u32 %s285_s5, 4  ;;  %s970_s19 = scalar_lea.hbm %s1019_s3, %s526_s6  ;;  %s965_s10 = int_to_ptr.vmem [resolvable:$true] %s366_s10 }
  0x51   : > { %v328_v31 = vmul.f32 %v292_v21, %v290_v0  ;;  %v329_v35 = vmul.f32 %v293_v25, %v291_v2  ;;  %v340_v38 = vadd.s32 %v339_v32, %v338_v29  ;;  %v295_v44 = vld [vmem:[%s253_s24 + $0x8] sm:$0xff]  ;;  %s350_s22 = scalar_lea.sflag [#allocation4], %s940_s9  ;;  %s691_s16 = scalar_lea.vmem %s965_s10, 256 }
  0x52   : > { %v304_v6 = vmul.f32 1.442695, %v302_v4  ;;  %v306_v7 = vmul.f32 1.442695, %v303_v5  ;;  %p692_p8 = scmp.ne.s32.totalorder %s965_s10, %s691_s16  ;;  %s780_s15 = smov [#allocation8]  }
  0x53   : > { %vm341_vm2 = vcmp.lt.s32.totalorder %v340_v38, 10  ;;  %s695_s23 = sshll.u32 %s780_s15, 4  ;;  %s696_s23 = int_to_ptr.vmem [resolvable:$false] %s695_s23 }
  0x54   : > { %599 = vpow2.f32 %v304_v6  ;;  %p693_p0 = pnand %p692_p8, %p856_p9  ;;  %s697_s20 = scalar_lea.vmem %s696_s23, 512 }
  0x55   : > { %601 = vpow2.f32 %v306_v7  ;;  %p698_p4 = scmp.lt.s32.totalorder %s965_s10, %s696_s23  ;;  %p699_p10 = scmp.lt.s32.totalorder %s697_s20, %s691_s16 }
  0x56   : > { %p694_p3 = pneg %p693_p0 }
  0x57   : > { %p700_p13 = por %p699_p10, %p698_p4 }
  0x59   : > { %p701_p12 = pnand %p700_p13, %p694_p3 }
  0x61   : > { %v600_v8 = vpop.eup %599 }
  0x62   : > { %v602_v9 = vpop.eup %601  ;;  %v308_v10 = vadd.f32 1.0, %v600_v8  ;;  %v311_v12 = vmul.f32 -0.5, %v600_v8  ;;  %v314_v16 = vand.u32 2147483647, %v600_v8 }
  0x63   : > { %v317_v11 = vadd.f32 1.0, %v602_v9  ;;  %v320_v13 = vmul.f32 -0.5, %v602_v9  ;;  %v323_v20 = vand.u32 2147483647, %v602_v9 }
  0x64   : > { %603 = vlog2.f32 %v308_v10  ;;  %v312_v14 = vadd.f32 1.0, %v311_v12  ;;  %vm315_vm0 = vcmp.lt.f32.partialorder %v314_v16, 0.0004427343 }
  0x65   : > { %605 = vlog2.f32 %v317_v11  ;;  %v321_v17 = vadd.f32 1.0, %v320_v13  ;;  %vm324_vm1 = vcmp.lt.f32.partialorder %v323_v20, 0.0004427343 }
  0x66   : > { %v313_v22 = vmul.f32 %v600_v8, %v312_v14 }
  0x67   : > { %v322_v26 = vmul.f32 %v602_v9, %v321_v17 }
  0x71   : > { %v604_v23 = vpop.eup %603 }
  0x72   : > { %v606_v27 = vpop.eup %605  ;;  %v310_v28 = vmul.f32 0.6931472, %v604_v23 }
  0x73   : > { %v319_v33 = vmul.f32 0.6931472, %v606_v27 }
  0x74   : > { %v316_v34 = vsel %vm315_vm0, %v313_v22, %v310_v28 }
  0x75   : > { %v326_v36 = vsub.f32 %v298_v24, %v316_v34  ;;  %v325_v37 = vsel %vm324_vm1, %v322_v26, %v319_v33 }
  0x76   : > { %v327_v39 = vsub.f32 %v299_v30, %v325_v37 }
  0x77   : > { %v330_v40 = vadd.f32 %v328_v31, %v326_v36 }
  0x78   : > { %v331_v42 = vadd.f32 %v329_v35, %v327_v39 }
  0x79   : > { %v332_v43 = vsub.f32 0.0, %v330_v40 }
  0x7a   : > { %v333_v45 = vsub.f32 0.0, %v331_v42 }
  0x7b   : > { %v334_v46 = vmul.f32 %v332_v43, %v294_v41 }
  0x7c   : > { %v335_v47 = vmul.f32 %v333_v45, %v295_v44 }
  0x7d   : > { %v342_v48 = vsel %vm341_vm2, %v334_v46, 0.0 }
  0x7e   : > { %346 = vst [vmem:[%s285_s5] sm:$0xff] %v342_v48  ;;  %v343_v49 = vsel %vm341_vm2, %v335_v47, 0.0 }
  0x7f   : > { %348 = vst.msk [vmem:[%s285_s5 + $0x8] sm:$0xff] %vm347_vm3, %v343_v49 }
  0x80   : > { %704 = shalt.err (!%p701_p12)
}
  0x81   : > { %s705_s29 = scalar_lea.hbm %s970_s19, 256  ;;  %s709_s4 = scalar_lea.hbm %s1019_s3, 512 }
  0x82   : > { %p706_p1 = scmp.ne.s32.totalorder %s970_s19, %s705_s29  ;;  %p710_p6 = scmp.lt.s32.totalorder %s970_s19, %s1019_s3 }
  0x83   : > { %p711_p7 = scmp.lt.s32.totalorder %s709_s4, %s705_s29 }
  0x84   : > { %p707_p2 = pnand %p706_p1, %p856_p9 }
  0x85   : > { %p712_p8 = por %p711_p7, %p710_p6 }
  0x86   : > { %p708_p5 = pneg %p707_p2 }
  0x88   : > { %p713_p0 = pnand %p712_p8, %p708_p5 }
  0x8a   : > { %716 = shalt.err (!%p713_p0)
}
  0x8b   : > { %533 = dma.vmem_to_hbm [thread:$0]  (%p856_p9), %s965_s10, 256, %s970_s19, %s350_s22  }
  0x8c PF: > { %s378_s30 = sand.u32 1, %s755_s12   ;;  %p1034_p3 = scmp.ge.s32.totalorder %s775_s17, 2 }
  0x8d   : > { %s379_s11 = scalar_lea.sflag [#allocation4], %s378_s30 }
  0x8e   : > { %p546_p4 = pnand %p1034_p3, %p863_p11 }
  0x90   : > { %p547_p10 = pneg %p546_p4 }
  0x92   : > { %750 = dma.done.wait (%p547_p10), %s379_s11, 256  }
  0x93   : > { %752 = vsyncadd (%p547_p10), %s379_s11, 4294967040  ;;  %s22_s17 = sadd.s32 1, %s775_s17   ;;  %s1035_s15 = sld [smem:[#allocation12_spill]] }
  0x94   : > { %p19_p13 = scmp.ge.s32.totalorder %s22_s17, 4   ;;  %s1036_s16 = sld [smem:[#allocation13_spill]] }
  0x95   : > { %s1037_s12 = smov %s759_s13  ;;  %s1038_s13 = smov %s763_s14 }
  0x96   : > { %s1039_s14 = smov %s861_s26  ;;  %21 = sbr.rel (!%p19_p13) target bundleno = 10 (0xa), region = 101 }
  0x9b   :  { %384 = vsyncpa [#allocation3], 1 }
  0x9c   :  { %386 = vsyncpa [#allocation3 + $0x1], 1 }
  0x9d   :  { %387 = vsyncpa [#allocation6], 1 }
  0x9e   :  { %389 = vsyncpa [#allocation6 + $0x1], 1 }
  0x9f   :  { %390 = vsyncpa [#allocation4], 1 }
  0xa0   :  { %392 = vsyncpa [#allocation4 + $0x1], 1 }

</bundles_post_ra>
